<compile_context>
chip_gen: v5e
topology: v5e:2x2
jax: 0.10.0
libtpu: 0.0.40
codegen_flags: <defaults>
</compile_context>

<pallas_src>
import functools

import jax
import jax.numpy as jnp
from jax.experimental import pallas as pl
from jax.experimental.pallas import tpu as pltpu

# ---- small synthetic config (mirrors module __init__ shapes) ----------------
B = 2            # batch
S = 8            # decoder sequence length
D_MODEL = 32     # model.config.d_model
HID = 128        # ldbr encoder width (fixed to 128 in the module)
NTASKS = 4       # args.ntasks
NUM_LABELS = 4   # model.config.num_labels
T_DISTILL = 1.0  # DistillKL temperature (self.kd_loss = DistillKL(1))

# Packed-parameter buffer layout (rows, 256 lanes), built ONCE at init:
#   rows [0, 32)         : W_gs = [Wg | Ws]                  (D_MODEL, 2*HID)
#   rows [32, 288)       : W_head = [0;Wt | Wc | 0] in lanes [0,128)   (2H, H)
#   row  288             : b_gs = [bg | bs]                  (1, 2*HID)
#   row  296             : b_head = [bt | bc | 0] in lanes [0,128)
ROW_WGS = 0
ROW_WHEAD = D_MODEL
ROW_BGS = ROW_WHEAD + 2 * HID          # 288 (8-aligned)
ROW_BHEAD = ROW_BGS + 8                # 296 (8-aligned)
PACK_ROWS = ROW_BHEAD + 8              # 304

# TODO(synk): the BART backbone forward (self.model(...)) is an external
# pretrained transformer and is not reproduced here; its last decoder hidden
# state is provided as a synthetic input.


# -----------------------------------------------------------------------------
# Fused kernel:
#   x        = student_hidden[:, -1, :]
#   gs       = tanh(x @ [Wg|Ws] + [bg|bs])          -> [general | specific]
#   head     = gs @ W_head + b_head                 -> [task_pred | logits | 0]
#   ce_loss  = CrossEntropyLoss()(logits, labels)   (mean over batch)
#   kl_loss  = DistillKL(T)(teacher_hidden, student_hidden)  (softmax, dim=1)
# -----------------------------------------------------------------------------
def _fused_kernel(labels_ref, hid_ref, params_ref,
                  gs_ref, head_ref, sent_ref, loss_ref,
                  *, T, seq_len, batch, num_labels, ntasks, d_model, hid_dim):
    two_hid = 2 * hid_dim

    stu = hid_ref[0]                                   # (B, S, D)
    tea = hid_ref[1]                                   # (B, S, D)

    # ---------------- ldbr head ----------------
    x = stu[:, seq_len - 1, :]                         # (B, D) sentence embedding
    sent_ref[...] = x

    w_gs = params_ref[ROW_WGS:ROW_WGS + d_model, :]                   # (D, 2H)
    w_head = params_ref[ROW_WHEAD:ROW_WHEAD + two_hid, 0:hid_dim]     # (2H, H)
    b_gs = params_ref[ROW_BGS:ROW_BGS + 1, :]                         # (1, 2H)
    b_head = params_ref[ROW_BHEAD:ROW_BHEAD + 1, 0:hid_dim]           # (1, H)

    gs = jnp.tanh(jnp.dot(x, w_gs, preferred_element_type=jnp.float32) + b_gs)
    gs_ref[...] = gs                                   # [general | specific], lane-dense

    head = jnp.dot(gs, w_head, preferred_element_type=jnp.float32) + b_head
    head_ref[...] = head                               # [task | logits | 0], lane-dense

    # ------------- cross entropy (vectorized, mean over batch) -------------
    lane = jax.lax.broadcasted_iota(jnp.int32, (batch, hid_dim), 1)   # (B, 128)
    valid = jnp.logical_and(lane >= ntasks, lane < ntasks + num_labels)
    neg = jnp.float32(-1e30)
    m = jnp.max(jnp.where(valid, head, neg), axis=-1, keepdims=True)  # (B, 1)
    e = jnp.where(valid, jnp.exp(head - m), 0.0)
    lse = m + jnp.log(jnp.sum(e, axis=-1, keepdims=True))             # (B, 1)
    tgt = labels_ref[...] + ntasks                                    # (B, 1) int32
    picked = jnp.sum(jnp.where(lane == tgt, head, 0.0),
                     axis=-1, keepdims=True)                          # (B, 1)
    loss_ref[0, 0] = jnp.sum(lse - picked) * (1.0 / batch)

    # ------- DistillKL(T)(y_s=teacher, y_t=student), softmax over dim=1 -----
    if T == 1.0:                                       # specialized: no scaling ops
        ys = tea                                       # log_softmax side (teacher)
        yt = stu                                       # softmax target (student)
    else:
        inv_t = jnp.float32(1.0 / T)
        ys = tea * inv_t
        yt = stu * inv_t

    ms = jnp.max(ys, axis=1, keepdims=True)
    log_ps = (ys - ms) - jnp.log(jnp.sum(jnp.exp(ys - ms), axis=1, keepdims=True))

    mt = jnp.max(yt, axis=1, keepdims=True)
    et = jnp.exp(yt - mt)
    denom = jnp.sum(et, axis=1, keepdims=True)
    pt = et / denom
    log_pt = (yt - mt) - jnp.log(denom)

    loss_ref[0, 1] = jnp.sum(pt * (log_pt - log_ps)) * (T * T / batch)


# -----------------------------------------------------------------------------
# MyBart.forward (ldbr + distill branches): one fused pallas_call.
# -----------------------------------------------------------------------------
@jax.jit
def my_bart_forward(student_dec_hidden, teacher_dec_hidden, labels, packed_params):
    b, seq_len, d_model = student_dec_hidden.shape

    hid = jnp.stack([student_dec_hidden, teacher_dec_hidden], axis=0)  # (2,B,S,D)
    labels_col = labels.astype(jnp.int32).reshape(b, 1)                # (B,1)

    kernel = functools.partial(
        _fused_kernel, T=float(T_DISTILL), seq_len=seq_len, batch=b,
        num_labels=NUM_LABELS, ntasks=NTASKS, d_model=d_model, hid_dim=HID)

    vmem = pl.BlockSpec(memory_space=pltpu.MemorySpace.VMEM)
    smem = pl.BlockSpec(memory_space=pltpu.MemorySpace.SMEM)

    out_shapes = (
        jax.ShapeDtypeStruct((b, 2 * HID), jnp.float32),   # [general | specific]
        jax.ShapeDtypeStruct((b, HID), jnp.float32),       # [task_pred | logits | 0]
        jax.ShapeDtypeStruct((b, d_model), jnp.float32),   # sentence embedding
        jax.ShapeDtypeStruct((1, 2), jnp.float32),         # [ce_loss, kd_loss] (SMEM)
    )

    gs, head, sent_emb, losses = pl.pallas_call(
        kernel,
        out_shape=out_shapes,
        in_specs=[vmem, vmem, vmem],
        out_specs=(vmem, vmem, vmem, smem),
    )(labels_col, hid, packed_params)

    return {
        "loss": losses[0, 0],
        "distill_loss": losses[0, 1],
        "logits": head[:, NTASKS:NTASKS + NUM_LABELS],
        "total_g_fea": gs[:, :HID],
        "total_s_fea": gs[:, HID:],
        "task_pred": head[:, :NTASKS],
        "sentence_embedding": sent_emb,
    }


def init_params(key):
    ks = jax.random.split(key, 8)
    scale_in = 1.0 / jnp.sqrt(D_MODEL)
    scale_h = 1.0 / jnp.sqrt(HID)
    scale_2h = 1.0 / jnp.sqrt(2 * HID)
    return {
        # General_Encoder: Linear(d_model, 128)
        "wg": jax.random.normal(ks[0], (D_MODEL, HID), jnp.float32) * scale_in,
        "bg": jax.random.normal(ks[1], (1, HID), jnp.float32) * 0.01,
        # Specific_Encoder: Linear(d_model, 128)
        "ws": jax.random.normal(ks[2], (D_MODEL, HID), jnp.float32) * scale_in,
        "bs": jax.random.normal(ks[3], (1, HID), jnp.float32) * 0.01,
        # task_classifier: Linear(128, ntasks)
        "wt": jax.random.normal(ks[4], (HID, NTASKS), jnp.float32) * scale_h,
        "bt": jax.random.normal(ks[5], (1, NTASKS), jnp.float32) * 0.01,
        # cls_classifier: Linear(2*128, num_labels)
        "wc": jax.random.normal(ks[6], (2 * HID, NUM_LABELS), jnp.float32) * scale_2h,
        "bc": jax.random.normal(ks[7], (1, NUM_LABELS), jnp.float32) * 0.01,
    }


def pack_params(p):
    """One-time host-side packing of all head parameters into a single buffer."""
    w_gs = jnp.concatenate([p["wg"], p["ws"]], axis=1)            # (D, 2H)
    b_gs = jnp.concatenate([p["bg"], p["bs"]], axis=1)            # (1, 2H)

    # Combined head weight: columns [0,NTASKS) = task classifier (acts on the
    # specific half only), columns [NTASKS, NTASKS+NUM_LABELS) = cls classifier
    # (acts on the full [g|s]), rest zero-padded to 128 lanes.
    w_head = jnp.zeros((2 * HID, HID), jnp.float32)
    w_head = w_head.at[HID:, :NTASKS].set(p["wt"])
    w_head = w_head.at[:, NTASKS:NTASKS + NUM_LABELS].set(p["wc"])

    b_head = jnp.zeros((1, HID), jnp.float32)
    b_head = b_head.at[:, :NTASKS].set(p["bt"])
    b_head = b_head.at[:, NTASKS:NTASKS + NUM_LABELS].set(p["bc"])

    buf = jnp.zeros((PACK_ROWS, 2 * HID), jnp.float32)
    buf = buf.at[ROW_WGS:ROW_WGS + D_MODEL, :].set(w_gs)
    buf = buf.at[ROW_WHEAD:ROW_WHEAD + 2 * HID, :HID].set(w_head)
    buf = buf.at[ROW_BGS, :].set(b_gs[0])
    buf = buf.at[ROW_BHEAD, :HID].set(b_head[0])
    return buf


if __name__ == "__main__":
    key = jax.random.PRNGKey(0)
    k_s, k_t, k_l, k_p = jax.random.split(key, 4)

    # Synthetic last decoder hidden states (stand-in for BART backbone output).
    student_hidden = jax.random.normal(k_s, (B, S, D_MODEL), jnp.float32)
    teacher_hidden = jax.random.normal(k_t, (B, S, D_MODEL), jnp.float32)
    labels = jax.random.randint(k_l, (B,), 0, NUM_LABELS, jnp.int32)
    params = init_params(k_p)
    packed = pack_params(params)   # packed ONCE, reused every forward call

    out = my_bart_forward(student_hidden, teacher_hidden, labels, packed)
    jax.block_until_ready(out)

    # ---- pure-JAX reference checks ----
    x = student_hidden[:, -1, :]
    g_ref = jnp.tanh(x @ params["wg"] + params["bg"])
    s_ref = jnp.tanh(x @ params["ws"] + params["bs"])
    task_ref = s_ref @ params["wt"] + params["bt"]
    logits_ref = jnp.concatenate([g_ref, s_ref], axis=1) @ params["wc"] + params["bc"]
    assert jnp.allclose(out["total_g_fea"], g_ref, atol=1e-4)
    assert jnp.allclose(out["total_s_fea"], s_ref, atol=1e-4)
    assert jnp.allclose(out["task_pred"], task_ref, atol=1e-4)
    assert jnp.allclose(out["logits"], logits_ref, atol=1e-4)
    assert jnp.allclose(out["sentence_embedding"], x, atol=1e-6)

    log_probs = jax.nn.log_softmax(logits_ref, axis=1)
    ce_ref = -jnp.mean(log_probs[jnp.arange(B), labels])
    assert jnp.allclose(out["loss"], ce_ref, atol=1e-4)

    # DistillKL: module calls kd_loss(teacher_hidden, student_hidden), so the
    # teacher is the log_softmax (y_s) side and the student is the target.
    log_ps = jax.nn.log_softmax(teacher_hidden / T_DISTILL, axis=1)
    p_t = jax.nn.softmax(student_hidden / T_DISTILL, axis=1)
    kl_ref = jnp.sum(p_t * (jnp.log(p_t) - log_ps)) * T_DISTILL ** 2 / B
    assert jnp.allclose(out["distill_loss"], kl_ref, atol=1e-4)

    print("KERNEL_OK")
</pallas_src>

<mosaic_0001>
module attributes {stable_mosaic.version = 11 : i64} {
  func.func @_fused_kernel(%arg0: memref<2x1xi32, #tpu.memory_space<vmem>>, %arg1: memref<2x2x8x32xf32, #tpu.memory_space<vmem>>, %arg2: memref<304x256xf32, #tpu.memory_space<vmem>>, %arg3: memref<2x256xf32, #tpu.memory_space<vmem>>, %arg4: memref<2x128xf32, #tpu.memory_space<vmem>>, %arg5: memref<2x32xf32, #tpu.memory_space<vmem>>, %arg6: memref<1x2xf32, #tpu.memory_space<smem>>) attributes {dimension_semantics = [], scalar_prefetch = 0 : i64, scratch_operands = 0 : i64, tpu.core_type = #tpu.core_type<tc>} {
    %c0 = arith.constant 0 : index
    %c0_0 = arith.constant 0 : index
    %c0_1 = arith.constant 0 : index
    %c0_2 = arith.constant 0 : index
    %0 = vector.load %arg1[%c0, %c0_0, %c0_1, %c0_2] : memref<2x2x8x32xf32, #tpu.memory_space<vmem>>, vector<1x2x8x32xf32>
    %1 = vector.shape_cast %0 : vector<1x2x8x32xf32> to vector<2x8x32xf32>
    %c1 = arith.constant 1 : index
    %c0_3 = arith.constant 0 : index
    %c0_4 = arith.constant 0 : index
    %c0_5 = arith.constant 0 : index
    %2 = vector.load %arg1[%c1, %c0_3, %c0_4, %c0_5] : memref<2x2x8x32xf32, #tpu.memory_space<vmem>>, vector<1x2x8x32xf32>
    %3 = vector.shape_cast %2 : vector<1x2x8x32xf32> to vector<2x8x32xf32>
    %4 = vector.extract_strided_slice %1 {offsets = [0, 7, 0], sizes = [2, 1, 32], strides = [1, 1, 1]} : vector<2x8x32xf32> to vector<2x1x32xf32>
    %5 = vector.shape_cast %4 : vector<2x1x32xf32> to vector<2x32xf32>
    %c0_6 = arith.constant 0 : index
    %c0_7 = arith.constant 0 : index
    %6 = vector.load %arg5[%c0_6, %c0_7] : memref<2x32xf32, #tpu.memory_space<vmem>>, vector<2x32xf32>
    tpu.vector_store %arg5[%c0_6, %c0_7], %5 {strides = array<i32>} : memref<2x32xf32, #tpu.memory_space<vmem>>, vector<2x32xf32>,
    %c0_8 = arith.constant 0 : index
    %c0_9 = arith.constant 0 : index
    %7 = vector.load %arg2[%c0_8, %c0_9] : memref<304x256xf32, #tpu.memory_space<vmem>>, vector<32x256xf32>
    %c32 = arith.constant 32 : index
    %c0_10 = arith.constant 0 : index
    %8 = vector.load %arg2[%c32, %c0_10] : memref<304x256xf32, #tpu.memory_space<vmem>>, vector<256x128xf32>
    %c288 = arith.constant 288 : index
    %c0_11 = arith.constant 0 : index
    %9 = vector.load %arg2[%c288, %c0_11] : memref<304x256xf32, #tpu.memory_space<vmem>>, vector<1x256xf32>
    %c296 = arith.constant 296 : index
    %c0_12 = arith.constant 0 : index
    %10 = vector.load %arg2[%c296, %c0_12] : memref<304x256xf32, #tpu.memory_space<vmem>>, vector<1x128xf32>
    %cst = arith.constant dense<0.000000e+00> : vector<2x256xf32>
    %11 = tpu.matmul %5, %7, %cst {dimension_numbers = #tpu.dot_dimension_numbers<[1], [0], [0], [1], [0, 0, 1, 1], [], []>} : vector<2x32xf32>, vector<32x256xf32>, vector<2x256xf32> -> vector<2x256xf32>
    %12 = vector.broadcast %9 : vector<1x256xf32> to vector<2x256xf32>
    %13 = arith.addf %11, %12 : vector<2x256xf32>
    %14 = math.tanh %13 : vector<2x256xf32>
    %c0_13 = arith.constant 0 : index
    %c0_14 = arith.constant 0 : index
    %15 = vector.load %arg3[%c0_13, %c0_14] : memref<2x256xf32, #tpu.memory_space<vmem>>, vector<2x256xf32>
    tpu.vector_store %arg3[%c0_13, %c0_14], %14 {strides = array<i32>} : memref<2x256xf32, #tpu.memory_space<vmem>>, vector<2x256xf32>,
    %cst_15 = arith.constant dense<0.000000e+00> : vector<2x128xf32>
    %16 = tpu.matmul %14, %8, %cst_15 {dimension_numbers = #tpu.dot_dimension_numbers<[1], [0], [0], [1], [0, 0, 1, 1], [], []>} : vector<2x256xf32>, vector<256x128xf32>, vector<2x128xf32> -> vector<2x128xf32>
    %17 = vector.broadcast %10 : vector<1x128xf32> to vector<2x128xf32>
    %18 = arith.addf %16, %17 : vector<2x128xf32>
    %c0_16 = arith.constant 0 : index
    %c0_17 = arith.constant 0 : index
    %19 = vector.load %arg4[%c0_16, %c0_17] : memref<2x128xf32, #tpu.memory_space<vmem>>, vector<2x128xf32>
    tpu.vector_store %arg4[%c0_16, %c0_17], %18 {strides = array<i32>} : memref<2x128xf32, #tpu.memory_space<vmem>>, vector<2x128xf32>,
    %20 = tpu.iota {dimensions = array<i32: 1>} : vector<2x128xi32>
    %c4_i32 = arith.constant 4 : i32
    %21 = vector.broadcast %c4_i32 : i32 to vector<2x128xi32>
    %22 = arith.cmpi sge, %20, %21 : vector<2x128xi32>
    %c8_i32 = arith.constant 8 : i32
    %23 = vector.broadcast %c8_i32 : i32 to vector<2x128xi32>
    %24 = arith.cmpi slt, %20, %23 : vector<2x128xi32>
    %25 = arith.andi %22, %24 : vector<2x128xi1>
    %cst_18 = arith.constant -1.000000e+30 : f32
    %26 = vector.broadcast %cst_18 : f32 to vector<2x128xf32>
    %27 = arith.select %25, %18, %26 : vector<2x128xi1>, vector<2x128xf32>
    %cst_19 = arith.constant dense<0xFF800000> : vector<2xf32>
    %28 = vector.multi_reduction <maximumf>, %27, %cst_19 [1] : vector<2x128xf32> to vector<2xf32>
    %29 = vector.shape_cast %28 : vector<2xf32> to vector<2x1xf32>
    %30 = vector.broadcast %29 : vector<2x1xf32> to vector<2x128xf32>
    %31 = arith.subf %18, %30 : vector<2x128xf32>
    %32 = math.exp %31 : vector<2x128xf32>
    %cst_20 = arith.constant 0.000000e+00 : f32
    %33 = vector.broadcast %cst_20 : f32 to vector<2x128xf32>
    %34 = arith.select %25, %32, %33 : vector<2x128xi1>, vector<2x128xf32>
    %cst_21 = arith.constant dense<0.000000e+00> : vector<2xf32>
    %35 = vector.multi_reduction <add>, %34, %cst_21 [1] : vector<2x128xf32> to vector<2xf32>
    %36 = vector.shape_cast %35 : vector<2xf32> to vector<2x1xf32>
    %37 = math.log %36 : vector<2x1xf32>
    %38 = arith.addf %29, %37 : vector<2x1xf32>
    %c0_22 = arith.constant 0 : index
    %c0_23 = arith.constant 0 : index
    %39 = vector.load %arg0[%c0_22, %c0_23] : memref<2x1xi32, #tpu.memory_space<vmem>>, vector<2x1xi32>
    %c4_i32_24 = arith.constant 4 : i32
    %40 = vector.broadcast %c4_i32_24 : i32 to vector<2x1xi32>
    %41 = arith.addi %39, %40 : vector<2x1xi32>
    %42 = vector.broadcast %41 : vector<2x1xi32> to vector<2x128xi32>
    %43 = arith.cmpi eq, %20, %42 : vector<2x128xi32>
    %cst_25 = arith.constant 0.000000e+00 : f32
    %44 = vector.broadcast %cst_25 : f32 to vector<2x128xf32>
    %45 = arith.select %43, %18, %44 : vector<2x128xi1>, vector<2x128xf32>
    %cst_26 = arith.constant dense<0.000000e+00> : vector<2xf32>
    %46 = vector.multi_reduction <add>, %45, %cst_26 [1] : vector<2x128xf32> to vector<2xf32>
    %47 = vector.shape_cast %46 : vector<2xf32> to vector<2x1xf32>
    %48 = arith.subf %38, %47 : vector<2x1xf32>
    %49 = vector.shape_cast %48 : vector<2x1xf32> to vector<1x2x1xf32>
    %cst_27 = arith.constant dense<0.000000e+00> : vector<1xf32>
    %50 = vector.multi_reduction <add>, %49, %cst_27 [1, 2] : vector<1x2x1xf32> to vector<1xf32>
    %51 = vector.shape_cast %50 : vector<1xf32> to vector<1x1x1xf32>
    %52 = vector.extract %51[0, 0, 0] : f32 from vector<1x1x1xf32>
    %cst_28 = arith.constant 5.000000e-01 : f32
    %53 = arith.mulf %52, %cst_28 : f32
    %c0_29 = arith.constant 0 : index
    %c0_30 = arith.constant 0 : index
    %54 = memref.load %arg6[%c0_29, %c0_30] : memref<1x2xf32, #tpu.memory_space<smem>>
    memref.store %53, %arg6[%c0_29, %c0_30] : memref<1x2xf32, #tpu.memory_space<smem>>
    %cst_31 = arith.constant dense<0xFF800000> : vector<2x32xf32>
    %55 = vector.multi_reduction <maximumf>, %3, %cst_31 [1] : vector<2x8x32xf32> to vector<2x32xf32>
    %56 = vector.shape_cast %55 : vector<2x32xf32> to vector<2x1x32xf32>
    %57 = vector.broadcast %56 : vector<2x1x32xf32> to vector<2x8x32xf32>
    %58 = arith.subf %3, %57 : vector<2x8x32xf32>
    %59 = vector.broadcast %56 : vector<2x1x32xf32> to vector<2x8x32xf32>
    %60 = arith.subf %3, %59 : vector<2x8x32xf32>
    %61 = math.exp %60 : vector<2x8x32xf32>
    %cst_32 = arith.constant dense<0.000000e+00> : vector<2x32xf32>
    %62 = vector.multi_reduction <add>, %61, %cst_32 [1] : vector<2x8x32xf32> to vector<2x32xf32>
    %63 = vector.shape_cast %62 : vector<2x32xf32> to vector<2x1x32xf32>
    %64 = math.log %63 : vector<2x1x32xf32>
    %65 = vector.broadcast %64 : vector<2x1x32xf32> to vector<2x8x32xf32>
    %66 = arith.subf %58, %65 : vector<2x8x32xf32>
    %cst_33 = arith.constant dense<0xFF800000> : vector<2x32xf32>
    %67 = vector.multi_reduction <maximumf>, %1, %cst_33 [1] : vector<2x8x32xf32> to vector<2x32xf32>
    %68 = vector.shape_cast %67 : vector<2x32xf32> to vector<2x1x32xf32>
    %69 = vector.broadcast %68 : vector<2x1x32xf32> to vector<2x8x32xf32>
    %70 = arith.subf %1, %69 : vector<2x8x32xf32>
    %71 = math.exp %70 : vector<2x8x32xf32>
    %cst_34 = arith.constant dense<0.000000e+00> : vector<2x32xf32>
    %72 = vector.multi_reduction <add>, %71, %cst_34 [1] : vector<2x8x32xf32> to vector<2x32xf32>
    %73 = vector.shape_cast %72 : vector<2x32xf32> to vector<2x1x32xf32>
    %74 = vector.broadcast %73 : vector<2x1x32xf32> to vector<2x8x32xf32>
    %75 = arith.divf %71, %74 : vector<2x8x32xf32>
    %76 = vector.broadcast %68 : vector<2x1x32xf32> to vector<2x8x32xf32>
    %77 = arith.subf %1, %76 : vector<2x8x32xf32>
    %78 = math.log %73 : vector<2x1x32xf32>
    %79 = vector.broadcast %78 : vector<2x1x32xf32> to vector<2x8x32xf32>
    %80 = arith.subf %77, %79 : vector<2x8x32xf32>
    %81 = arith.subf %80, %66 : vector<2x8x32xf32>
    %82 = arith.mulf %75, %81 : vector<2x8x32xf32>
    %83 = vector.shape_cast %82 : vector<2x8x32xf32> to vector<1x2x8x32xf32>
    %cst_35 = arith.constant dense<0.000000e+00> : vector<1xf32>
    %84 = vector.multi_reduction <add>, %83, %cst_35 [1, 2, 3] : vector<1x2x8x32xf32> to vector<1xf32>
    %85 = vector.shape_cast %84 : vector<1xf32> to vector<1x1x1x1xf32>
    %86 = vector.extract %85[0, 0, 0, 0] : f32 from vector<1x1x1x1xf32>
    %cst_36 = arith.constant 5.000000e-01 : f32
    %87 = arith.mulf %86, %cst_36 : f32
    %c0_37 = arith.constant 0 : index
    %c1_38 = arith.constant 1 : index
    %88 = memref.load %arg6[%c0_37, %c1_38] : memref<1x2xf32, #tpu.memory_space<smem>>
    memref.store %87, %arg6[%c0_37, %c1_38] : memref<1x2xf32, #tpu.memory_space<smem>>
    return
  }
}

</mosaic_0001>

<bundles_post_ra>
// kernel: my_bart_forward.1
= control target key start
LH: loop header
LB: loop body
LE: loop exit
PB: predicated region body
PF: predicated region fallthrough
CT: control target
= control target key end

     0   :  { %12 = vsyncpa [#allocation3], 0  ;;  %s664_s0 = inlined_call_operand.vmem [shape: s32[2,1], index: 0, kind: input, shape index: {}]   ;;  %s665_s1 = inlined_call_operand.vmem [shape: f32[2,2,8,32], index: 1, kind: input, shape index: {}]   ;;  %s666_s2 = inlined_call_operand.hbm [shape: f32[304,256], index: 2, kind: input, shape index: {}]   ;;  %s667_s3 = inlined_call_operand.vmem [shape: f32[2,256], index: 3, kind: output, shape index: {0}]   ;;  %s668_s4 = inlined_call_operand.vmem [shape: f32[2,128], index: 4, kind: output, shape index: {1}]   ;;  %s669_s5 = inlined_call_operand.hbm [shape: f32[2,32], index: 5, kind: output, shape index: {2}]   ;;  %s670_s6 = inlined_call_operand.vmem [shape: f32[1,2], index: 6, kind: output, shape index: {3}]  }
   0x1   :  { %13 = vsyncpa [#allocation4], 0 }
   0x2   :  { %14 = vsyncpa [#allocation5], 0  ;;  %s23_s23 = sshll.u32 %s666_s2, 4  ;;  %s517_s24 = smov [#allocation2]   ;;  %s24_s23 = int_to_ptr.hbm [resolvable:$true] %s23_s23 }
   0x3   :  { %s25_s25 = sshll.u32 %s517_s24, 4  ;;  %s518_s26 = smov 256   ;;  %s26_s25 = int_to_ptr.vmem [resolvable:$true] %s25_s25 }
   0x4   :  { %s519_s27 = smov 16  }
   0x5   :  { %31 = dma.hbm_to_vmem [thread:$0]  %s24_s23, 9728, %s26_s25, [#allocation3], %s518_s26, %s518_s26, %s519_s27  }
   0x6   :  { %511 = dma.done.wait [#allocation3], 9728  }
   0x7   :  { %512 = vsyncadd [#allocation3], 4294957568  ;;  %v56_v0 = vld [vmem:[#allocation2 + $0x30] sm:$0xff]  ;;  %v57_v1 = vld [vmem:[#allocation2 + $0x38] sm:$0xff]  ;;  %vm100_vm0 = vcmask 1041409   ;;  %vm102_vm1 = vcmask 261120   ;;  %v195_v57 = vlaneseq }
   0x8   :  { %v54_v2 = vld [vmem:[#allocation2 + $0x20] sm:$0xff]  ;;  %117 = vmatpush.msra.mxu0 %v56_v0  ;;  %137 = vmatpush.msra.mxu1 %v57_v1  ;;  %v55_v3 = vld [vmem:[#allocation2 + $0x28] sm:$0xff]  ;;  %v52_v4 = vld [vmem:[#allocation2 + $0x10] sm:$0xff]  ;;  %vm150_vm2 = vcmask 1041408   ;;  %v520_v56 = vmov 0   ;;  %vm225_vm15 = vcmask 1024  }
   0x9   :  { %v53_v5 = vld [vmem:[#allocation2 + $0x18] sm:$0xff]  ;;  %v564_v6 = vld [vmem:[%s665_s1] sm:$0xff]  ;;  %v569_v7 = vld [vmem:[%s665_s1 + $0x8] sm:$0xff]  ;;  %422 = vset.pattern.permute.xlu0 %v520_v56  ;;  %v196_v58 = vand.u32 127, %v195_v57  ;;  %s379_s17 = sshll.u32 %s669_s5, 4  ;;  %s388_s22 = sshll.u32 %s670_s6, 4  ;;  %s380_s17 = int_to_ptr.hbm [resolvable:$true] %s379_s17  ;;  %s389_s22 = int_to_ptr.vmem [resolvable:$true] %s388_s22 }
   0xa   :  { %118 = vmatpush.msra.mxu0 %v54_v2  ;;  %138 = vmatpush.msra.mxu1 %v55_v3  ;;  %v98_v8 = vrot.slane %v564_v6, 7  ;;  %v73_v9 = vld [vmem:[#allocation2 + $0x130] sm:$0xff]  ;;  %v72_v10 = vld [vmem:[#allocation2 + $0x120] sm:$0xff]  ;;  %v51_v12 = vld [vmem:[#allocation2 + $0x8] sm:$0xff]  ;;  %v99_v13 = vrot.slane %v569_v7, 6  ;;  %s522_s5 = smov [#allocation7]  }
   0xb   :  { %v50_v11 = vld [vmem:[#allocation2] sm:$0xff]  ;;  %154 = vmatpush.msra.mxu2 %v73_v9  ;;  %v89_v14 = vld [vmem:[#allocation2 + $0x230] sm:$0xff]  ;;  %vm197_vm3 = vcmp.ge.s32.totalorder %v196_v58, 4  ;;  %vm198_vm4 = vcmp.lt.s32.totalorder %v196_v58, 8 }
   0xc   :  { %119 = vmatpush.msra.mxu0 %v52_v4  ;;  %139 = vmatpush.msra.mxu1 %v53_v5  ;;  %v101_v15 = vsel %vm100_vm0, %v99_v13, %v98_v8  ;;  %v71_v16 = vld [vmem:[#allocation2 + $0x110] sm:$0xff]  ;;  %v88_v17 = vld [vmem:[#allocation2 + $0x220] sm:$0xff]  ;;  %vm579_vm5 = vmand %vm197_vm3, %vm198_vm4  ;;  %vm46_vm0 = vcmask 261127  }
   0xd   :  { %155 = vmatpush.msra.mxu2 %v72_v10  ;;  %174 = vmatpush.msra.mxu3 %v89_v14  ;;  %v70_v18 = vld [vmem:[#allocation2 + $0x100] sm:$0xff]  ;;  %v87_v19 = vld [vmem:[#allocation2 + $0x210] sm:$0xff]  ;;  %47 = vst.msk [vmem:[#allocation6 - $0x7] sm:$0x80] %vm46_vm0, %v564_v6 }
   0xe   :  { %120 = vmatpush.msra.mxu0 %v50_v11  ;;  %140 = vmatpush.msra.mxu1 %v51_v12  ;;  %v69_v20 = vld [vmem:[#allocation2 + $0xf0] sm:$0xff]  ;;  %v86_v21 = vld [vmem:[#allocation2 + $0x200] sm:$0xff] }
   0xf   :  { %410 = vmatmul.msk.f32.vlgmr.msra.gmra.mxu0 %vm102_vm1, %v101_v15  ;;  %411 = vmatmul.msk.f32.vlgmr.msra.gmra.mxu1 %vm102_vm1, %v101_v15  ;;  %v68_v22 = vld [vmem:[#allocation2 + $0xe0] sm:$0xff]  ;;  %v85_v23 = vld [vmem:[#allocation2 + $0x1f0] sm:$0xff] }
  0x10   :  { %156 = vmatpush.msra.mxu2 %v71_v16  ;;  %175 = vmatpush.msra.mxu3 %v88_v17  ;;  %v67_v24 = vld [vmem:[#allocation2 + $0xd0] sm:$0xff]  ;;  %v84_v25 = vld [vmem:[#allocation2 + $0x1e0] sm:$0xff]  ;;  %v279_v16 = vsel %vm102_vm1, %v564_v6, -inf  ;;  %v286_v17 = vsel %vm102_vm1, %v569_v7, -inf }
  0x11   :  { %v66_v26 = vld [vmem:[#allocation2 + $0xc0] sm:$0xff]  ;;  %v83_v27 = vld [vmem:[#allocation2 + $0x1d0] sm:$0xff] }
  0x12   :  { %157 = vmatpush.msra.mxu2 %v70_v18  ;;  %176 = vmatpush.msra.mxu3 %v87_v19  ;;  %v65_v28 = vld [vmem:[#allocation2 + $0xb0] sm:$0xff]  ;;  %v82_v29 = vld [vmem:[#allocation2 + $0x1c0] sm:$0xff]  ;;  %v280_v18 = vrot.slane %v279_v16, 4  ;;  %v287_v19 = vrot.slane %v286_v17, 4 }
  0x13   :  { %v64_v30 = vld [vmem:[#allocation2 + $0xa0] sm:$0xff]  ;;  %v81_v31 = vld [vmem:[#allocation2 + $0x1b0] sm:$0xff] }
  0x14   :  { %158 = vmatpush.msra.mxu2 %v69_v20  ;;  %177 = vmatpush.msra.mxu3 %v86_v21  ;;  %v63_v32 = vld [vmem:[#allocation2 + $0x90] sm:$0xff]  ;;  %v80_v33 = vld [vmem:[#allocation2 + $0x1a0] sm:$0xff]  ;;  %v281_v20 = vmax.f32 %v279_v16, %v280_v18  ;;  %v288_v21 = vmax.f32 %v286_v17, %v287_v19 }
  0x15   :  { %v62_v34 = vld [vmem:[#allocation2 + $0x80] sm:$0xff]  ;;  %v79_v35 = vld [vmem:[#allocation2 + $0x190] sm:$0xff] }
  0x16   :  { %159 = vmatpush.msra.mxu2 %v68_v22  ;;  %178 = vmatpush.msra.mxu3 %v85_v23  ;;  %v61_v36 = vld [vmem:[#allocation2 + $0x70] sm:$0xff]  ;;  %v78_v37 = vld [vmem:[#allocation2 + $0x180] sm:$0xff]  ;;  %v409_v23 = vld [vmem:[%s665_s1 + $0x18] sm:$0xff] }
  0x17   :  { %v60_v38 = vld [vmem:[#allocation2 + $0x60] sm:$0xff]  ;;  %v77_v39 = vld [vmem:[#allocation2 + $0x170] sm:$0xff] }
  0x18   :  { %160 = vmatpush.msra.mxu2 %v67_v24  ;;  %179 = vmatpush.msra.mxu3 %v84_v25  ;;  %v59_v40 = vld [vmem:[#allocation2 + $0x50] sm:$0xff]  ;;  %v76_v41 = vld [vmem:[#allocation2 + $0x160] sm:$0xff]  ;;  %v282_v24 = vrot.slane %v281_v20, 2  ;;  %v289_v25 = vrot.slane %v288_v21, 2 }
  0x19   :  { %v58_v42 = vld [vmem:[#allocation2 + $0x40] sm:$0xff]  ;;  %v75_v43 = vld [vmem:[#allocation2 + $0x150] sm:$0xff] }
  0x1a   :  { %161 = vmatpush.msra.mxu2 %v66_v26  ;;  %180 = vmatpush.msra.mxu3 %v83_v27  ;;  %v74_v44 = vld [vmem:[#allocation2 + $0x140] sm:$0xff]  ;;  %v92_v59 = vld [vmem:[#allocation2 + $0x250] ss:$0 sm:$0xff]  ;;  %v246_v27 = vsel %vm102_vm1, %v409_v23, -inf }
  0x1b   :  { %v91_v45 = vld [vmem:[#allocation2 + $0x240] ss:$8 sm:$0x3]  ;;  %v408_v22 = vld [vmem:[%s665_s1 + $0x10] sm:$0xff]  ;;  %s521_s1 = smov [#allocation6]  }
  0x1c   :  { %162 = vmatpush.msra.mxu2 %v65_v28  ;;  %181 = vmatpush.msra.mxu3 %v82_v29  ;;  %v94_v46 = vperm.slane %v91_v45, 0  ;;  %v95_v47 = vperm.slane %v91_v45, 1  ;;  %v214_v3 = vld [vmem:[%s664_s0] sm:$0x3]  ;;  %v239_v26 = vsel %vm102_vm1, %v408_v22, -inf  ;;  %v247_v29 = vrot.slane %v246_v27, 4 }
  0x1d   :  { %v215_v4 = vadd.s32 4, %v214_v3  ;;  %v240_v28 = vrot.slane %v239_v26, 4  ;;  %s377_s14 = sshll.u32 %s521_s1, 4  ;;  %s378_s14 = int_to_ptr.vmem [resolvable:$true] %s377_s14 }
  0x1e   :  { %163 = vmatpush.msra.mxu2 %v64_v30  ;;  %182 = vmatpush.msra.mxu3 %v81_v31  ;;  %v283_v30 = vmax.f32 %v281_v20, %v282_v24  ;;  %v290_v31 = vmax.f32 %v288_v21, %v289_v25 }
  0x20   :  { %164 = vmatpush.msra.mxu2 %v63_v32  ;;  %183 = vmatpush.msra.mxu3 %v80_v33  ;;  %v241_v32 = vmax.f32 %v239_v26, %v240_v28  ;;  %v248_v33 = vmax.f32 %v246_v27, %v247_v29 }
  0x22   :  { %165 = vmatpush.msra.mxu2 %v62_v34  ;;  %184 = vmatpush.msra.mxu3 %v79_v35  ;;  %v284_v34 = vrot.slane %v283_v30, 1  ;;  %v291_v35 = vrot.slane %v290_v31, 1 }
  0x24   :  { %166 = vmatpush.msra.mxu2 %v61_v36  ;;  %185 = vmatpush.msra.mxu3 %v78_v37  ;;  %v242_v36 = vrot.slane %v241_v32, 2  ;;  %v249_v37 = vrot.slane %v248_v33, 2 }
  0x26   :  { %167 = vmatpush.msra.mxu2 %v60_v38  ;;  %186 = vmatpush.msra.mxu3 %v77_v39  ;;  %v285_v38 = vmax.f32 %v283_v30, %v284_v34  ;;  %v292_v39 = vmax.f32 %v290_v31, %v291_v35 }
  0x28   :  { %168 = vmatpush.msra.mxu2 %v59_v40  ;;  %187 = vmatpush.msra.mxu3 %v76_v41  ;;  %v243_v40 = vmax.f32 %v241_v32, %v242_v36  ;;  %v250_v41 = vmax.f32 %v248_v33, %v249_v37 }
  0x2a   :  { %169 = vmatpush.msra.mxu2 %v58_v42  ;;  %188 = vmatpush.msra.mxu3 %v75_v43  ;;  %v612_v42 = vsub.f32 %v564_v6, %v285_v38  ;;  %v615_v43 = vsub.f32 %v569_v7, %v292_v39  ;;  %v251_v45 = vrot.slane %v250_v41, 1 }
  0x2c   :  { %189 = vmatpush.msra.mxu3 %v74_v44  ;;  %v244_v44 = vrot.slane %v243_v40, 1 }
  0x8c   :  { %v122_v48 = vpop.f32.mrf.mxu0  ;;  %v142_v49 = vpop.f32.mrf.mxu1 }
  0x8d   :  { %v123_v50 = vadd.f32 %v122_v48, %v94_v46  ;;  %v143_v51 = vadd.f32 %v142_v49, %v95_v47  ;;  %v295_v46 = vmul.f32 1.442695, %v612_v42  ;;  %v297_v47 = vmul.f32 1.442695, %v615_v43 }
  0x8e   :  { %v245_v48 = vmax.f32 %v243_v40, %v244_v44  ;;  %v252_v49 = vmax.f32 %v250_v41, %v251_v45 }
  0x8f   :  { %423 = vtanh.f32 %v123_v50 }
  0x90   :  { %425 = vtanh.f32 %v143_v51  ;;  %v619_v50 = vsub.f32 %v408_v22, %v245_v48  ;;  %v621_v51 = vsub.f32 %v409_v23, %v252_v49 }
  0x95   :  { %v424_v52 = vpop.eup %423 }
  0x96   :  { %v426_v53 = vpop.eup %425  ;;  %170 = vmatmul.f32.vlgmr.msra.gmra.mxu2 %v424_v52 }
  0x97   :  { %v149_v54 = vrot.slane %v426_v53, 6  ;;  %190 = vmatmul.f32.vlgmr.msra.gmra.mxu3 %v426_v53  ;;  %v257_v53 = vmul.f32 1.442695, %v621_v51 }
  0x99   :  { %v151_v55 = vsel %vm150_vm2, %v424_v52, %v149_v54  ;;  %v255_v52 = vmul.f32 1.442695, %v619_v50 }
  0x9a   :  { %153 = vst [vmem:[%s667_s3] sm:$0xf] %v151_v55 }
 0x119   :  { %v171_v60 = vpop.f32.mrf.mxu2 }
 0x11a   :  { %v172_v61 = vadd.f32 %v171_v60, %v92_v59  ;;  %v191_v62 = vpop.f32.mrf.mxu3 }
 0x11c   :  { %v192_v0 = vadd.f32 %v191_v62, %v172_v61 }
 0x11e   :  { %194 = vst [vmem:[%s668_s4] sm:$0x3] %v192_v0  ;;  %v200_v1 = vsel %vm579_vm5, %v192_v0, -1e+30 }
 0x11f   :  { %v201_v2 = vsel %vm150_vm2, %v200_v1, -inf }
 0x120   :  { %202 = vmax.xlane.f32.xlu0 %v201_v2 }
 0x134   :  { %217 = vperm.xlu0 %422, %v215_v4  }
 0x193   :  { %v592_v5 = vpop.xlane.xlu0 %202 }
 0x194   :  { %v204_v8 = vsub.f32 %v192_v0, %v592_v5 }
 0x196   :  { %v205_v9 = vmul.f32 1.442695, %v204_v8 }
 0x198   :  { %427 = vpow2.f32 %v205_v9 }
 0x199   :  { %429 = vpow2.f32 %v295_v46 }
 0x19a   :  { %431 = vpow2.f32 %v297_v47 }
 0x19b   :  { %433 = vpow2.f32 %v255_v52 }
 0x19c   :  { %435 = vpow2.f32 %v257_v53 }
 0x19e   :  { %v428_v10 = vpop.eup %427 }
 0x19f   :  { %v207_v11 = vsel %vm579_vm5, %v428_v10, 0.0  ;;  %v625_v54 = vpop.eup %429 }
 0x1a0   :  { %v208_v12 = vsel %vm150_vm2, %v207_v11, 0.0  ;;  %v627_v55 = vpop.eup %431  ;;  %v299_v56 = vsel %vm102_vm1, %v625_v54, 0.0 }
 0x1a1   :  { %209 = vadd.xlane.f32.xlu1 %v208_v12  ;;  %v300_v57 = vrot.slane %v299_v56, 4  ;;  %v434_v62 = vpop.eup %433 }
 0x1a2   :  { %v259_v1 = vsel %vm102_vm1, %v434_v62, 0.0 }
 0x1a3   :  { %v301_v60 = vadd.f32 %v300_v57, %v299_v56  ;;  %v260_v4 = vrot.slane %v259_v1, 4 }
 0x1a5   :  { %v302_v63 = vrot.slane %v301_v60, 2  ;;  %v261_v11 = vadd.f32 %v260_v4, %v259_v1 }
 0x1a6   :  { %v218_v13 = vpop.permute.xlu0 %217 }
 0x1a7   :  { %vm219_vm6 = vcmp.eq.s32.totalorder %v196_v58, %v218_v13  ;;  %v306_v58 = vsel %vm102_vm1, %v627_v55, 0.0  ;;  %v303_v8 = vadd.f32 %v302_v63, %v301_v60 }
 0x1a8   :  { %v220_v14 = vsel %vm219_vm6, %v192_v0, 0.0  ;;  %v307_v59 = vrot.slane %v306_v58, 4  ;;  %v436_v0 = vpop.eup %435 }
 0x1a9   :  { %v221_v15 = vsel %vm150_vm2, %v220_v14, 0.0  ;;  %v266_v3 = vsel %vm102_vm1, %v436_v0, 0.0  ;;  %v304_v12 = vrot.slane %v303_v8, 1 }
 0x1aa   :  { %222 = vadd.xlane.f32.xlu1 %v221_v15  ;;  %v308_v61 = vadd.f32 %v307_v59, %v306_v58  ;;  %v267_v9 = vrot.slane %v266_v3, 4  ;;  %v262_v15 = vrot.slane %v261_v11, 2 }
 0x1ab   :  { %v305_v16 = vadd.f32 %v304_v12, %v303_v8 }
 0x1ac   :  { %v309_v2 = vrot.slane %v308_v61, 2  ;;  %v268_v13 = vadd.f32 %v267_v9, %v266_v3  ;;  %v263_v19 = vadd.f32 %v262_v15, %v261_v11 }
 0x1ad   :  { %437 = vrcp.f32 %v305_v16  ;;  %vm318_vm7 = vweird.f32 %v305_v16  ;;  %v324_v36 = vand.u32 2147483648, %v305_v16  ;;  %v322_v39 = vand.u32 2147483647, %v305_v16 }
 0x1ae   :  { %v310_v10 = vadd.f32 %v309_v2, %v308_v61  ;;  %v269_v17 = vrot.slane %v268_v13, 2  ;;  %v264_v21 = vrot.slane %v263_v19, 1 }
 0x1af   :  { %v325_v52 = vor.u32 1.1754944e-38, %v324_v36  ;;  %vm323_vm13 = vcmp.eq.f32.partialorder %v322_v39, 8.507059e+37 }
 0x1b0   :  { %v311_v14 = vrot.slane %v310_v10, 1  ;;  %v270_v20 = vadd.f32 %v269_v17, %v268_v13  ;;  %v265_v25 = vadd.f32 %v264_v21, %v263_v19 }
 0x1b2   :  { %v312_v18 = vadd.f32 %v311_v14, %v310_v10  ;;  %v271_v22 = vrot.slane %v270_v20, 1 }
 0x1b3   :  { %v438_v23 = vpop.eup %437 }
 0x1b4   :  { %439 = vrcp.f32 %v312_v18  ;;  %v272_v26 = vadd.f32 %v271_v22, %v270_v20  ;;  %v314_v27 = vmul.f32 %v438_v23, %v305_v16  ;;  %vm319_vm8 = vweird.f32 %v438_v23 }
 0x1b5   :  { %441 = vlog2.f32 %v265_v25  ;;  %vm333_vm9 = vweird.f32 %v312_v18  ;;  %v339_v40 = vand.u32 2147483648, %v312_v18  ;;  %vm635_vm11 = vmor %vm318_vm7, %vm319_vm8  ;;  %v337_v45 = vand.u32 2147483647, %v312_v18 }
 0x1b6   :  { %443 = vlog2.f32 %v272_v26  ;;  %v315_v29 = vsub.f32 1.0, %v314_v27  ;;  %v43_v27 = vrot.slane %v569_v7, 7 }
 0x1b7   :  { %445 = vlog2.f32 %v305_v16  ;;  %v340_v58 = vor.u32 1.1754944e-38, %v339_v40  ;;  %vm338_vm14 = vcmp.eq.f32.partialorder %v337_v45, 8.507059e+37 }
 0x1b8   :  { %447 = vlog2.f32 %v312_v18  ;;  %v316_v31 = vmul.f32 %v438_v23, %v315_v29 }
 0x1ba   :  { %v440_v24 = vpop.eup %439  ;;  %v317_v38 = vadd.f32 %v438_v23, %v316_v31 }
 0x1bb   :  { %v329_v28 = vmul.f32 %v440_v24, %v312_v18  ;;  %v442_v32 = vpop.eup %441  ;;  %vm334_vm10 = vweird.f32 %v440_v24 }
 0x1bc   :  { %v444_v34 = vpop.eup %443  ;;  %v274_v46 = vmul.f32 0.6931472, %v442_v32  ;;  %vm639_vm12 = vmor %vm333_vm9, %vm334_vm10  ;;  %v321_v57 = vsel %vm635_vm11, %v438_v23, %v317_v38 }
 0x1bd   :  { %v330_v30 = vsub.f32 1.0, %v329_v28  ;;  %v446_v35 = vpop.eup %445  ;;  %v276_v47 = vmul.f32 0.6931472, %v444_v34  ;;  %v326_v62 = vsel %vm323_vm13, %v325_v52, %v321_v57 }
 0x1be   :  { %v448_v37 = vpop.eup %447  ;;  %v344_v53 = vmul.f32 0.6931472, %v446_v35  ;;  %v277_v60 = vsub.f32 %v619_v50, %v274_v46  ;;  %v327_v3 = vmul.f32 %v625_v54, %v326_v62 }
 0x1bf   :  { %v331_v33 = vmul.f32 %v440_v24, %v330_v30  ;;  %v346_v56 = vmul.f32 0.6931472, %v448_v37  ;;  %v278_v61 = vsub.f32 %v621_v51, %v276_v47 }
 0x1c0   :  { %v347_v63 = vsub.f32 %v612_v42, %v344_v53 }
 0x1c1   :  { %v332_v44 = vadd.f32 %v440_v24, %v331_v33  ;;  %v348_v0 = vsub.f32 %v615_v43, %v346_v56 }
 0x1c2   :  { %v349_v9 = vsub.f32 %v347_v63, %v277_v60 }
 0x1c3   :  { %v336_v59 = vsel %vm639_vm12, %v440_v24, %v332_v44  ;;  %v350_v10 = vsub.f32 %v348_v0, %v278_v61 }
 0x1c4   :  { %v341_v1 = vsel %vm338_vm14, %v340_v58, %v336_v59  ;;  %v351_v51 = vmul.f32 %v349_v9, %v327_v3 }
 0x1c5   :  { %v342_v8 = vmul.f32 %v627_v55, %v341_v1 }
 0x1c6   :  { %v353_v42 = vsel %vm102_vm1, %v351_v51, 0.0 }
 0x1c7   :  { %v352_v13 = vmul.f32 %v350_v10, %v342_v8 }
 0x1c9   :  { %v354_v43 = vsel %vm102_vm1, %v352_v13, 0.0  ;;  %vm48_vm1 = vcmask 253952  }
 0x1ca   :  { %v355_v15 = vadd.f32 %v354_v43, %v353_v42  ;;  %49 = vst.msk [vmem:[#allocation6 + $0x1] sm:$0x1] %vm48_vm1, %v43_v27 }
 0x1cb   :  { %382 = dma.vmem_to_hbm [thread:$0]  %s378_s14, 32, %s380_s17, [#allocation4]  }
 0x214   :  { %v210_v49 = vpop.xlane.xlu1 %209 }
 0x215   :  { %449 = vlog2.f32 %v210_v49 }
 0x21b   :  { %v450_v2 = vpop.eup %449 }
 0x21c   :  { %v212_v4 = vmul.f32 0.6931472, %v450_v2 }
 0x21d   :  { %v223_v12 = vpop.xlane.xlu1 %222 }
 0x21e   :  { %v213_v11 = vadd.f32 %v212_v4, %v592_v5 }
 0x220   :  { %v224_v50 = vsub.f32 %v213_v11, %v223_v12 }
 0x222   :  { %v226_v14 = vsel %vm225_vm15, %v224_v50, 0.0 }
 0x223   :  { %227 = vadd.xlane.f32.xlu2 %v226_v14 }
 0x22b   :  { %356 = vadd.xlane.f32.xlu2 %v355_v15 }
 0x296   :  { %v228_v54 = vpop.xlane.xlu2 %227 }
 0x297   :  { %v229_v16 = vrot.slane %v228_v54, 4 }
 0x299   :  { %v230_v55 = vadd.f32 %v229_v16, %v228_v54 }
 0x29b   :  { %v231_v17 = vrot.slane %v230_v55, 2 }
 0x29d   :  { %v232_v18 = vadd.f32 %v231_v17, %v230_v55 }
 0x29e   :  { %v357_v19 = vpop.xlane.xlu2 %356 }
 0x29f   :  { %v358_v5 = vrot.slane %v357_v19, 4  ;;  %v233_v20 = vrot.slane %v232_v18, 1 }
 0x2a1   :  { %v359_v21 = vadd.f32 %v358_v5, %v357_v19  ;;  %v234_v22 = vadd.f32 %v233_v20, %v232_v18 }
 0x2a3   :  { %v360_v23 = vrot.slane %v359_v21, 2  ;;  %412 = vpush %v234_v22 }
 0x2a5   :  { %v361_v24 = vadd.f32 %v360_v23, %v359_v21 }
 0x2a7   :  { %v362_v25 = vrot.slane %v361_v24, 1 }
 0x2a9   :  { %v363_v26 = vadd.f32 %v362_v25, %v361_v24 }
 0x2ab   :  { %414 = vpush %v363_v26 }
 0x2d4   :  { %s413_s18 = spop %412 }
 0x2d5   :  { %s236_s19 = smul.f32 0.5, %s413_s18 }
 0x2d7   :  { %238 = sst [smem:[#allocation7]] %s236_s19 }
 0x2dc   :  { %s415_s23 = spop %414 }
 0x2dd   :  { %s365_s24 = smul.f32 0.5, %s415_s23 }
 0x2df   :  { %367 = sst [smem:[#allocation7 + $0x1]] %s365_s24 }
 0x2e0   :  { %391 = dma.smem_to_vmem %s522_s5, 16, %s389_s22, [#allocation5]  }
 0x2e1   :  { %513 = dma.done.wait [#allocation4], 32  }
 0x2e2   :  { %514 = vsyncadd [#allocation4], 4294967264 }
 0x2e3   :  { %515 = dma.done.wait [#allocation5], 16  }
 0x2e4   :  { %516 = vsyncadd [#allocation5], 4294967280 }
 0x2e5   :  { %404 = sfence }
 0x2e6   :  { %405 = vsyncpa [#allocation3], 1 }
 0x2e7   :  { %406 = vsyncpa [#allocation4], 1 }
 0x2e8   :  { %407 = vsyncpa [#allocation5], 1 }

</bundles_post_ra>
